<compile_context>
chip_gen: v7x
topology: tpu7x:2x2x1
jax: 0.10.0
libtpu: 0.0.40
codegen_flags: <defaults>
</compile_context>

<pallas_src>
import math

import jax
import jax.numpy as jnp
from jax.experimental import pallas as pl
from jax.experimental.pallas import tpu as pltpu


# ----------------------------------------------------------------------------
# pe buffer (matches the PyTorch registered buffer exactly)
# ----------------------------------------------------------------------------
def _build_pe(d_model: int, max_len: int = 4096) -> jnp.ndarray:
    """Positional-encoding buffer, shape (1, max_len, d_model), float32."""
    assert d_model % 2 == 0, "d_model must be even (matches the PyTorch buffer)"
    position = jnp.arange(max_len, dtype=jnp.float32)[:, None]            # (max_len, 1)
    div_term = jnp.exp(
        -math.log(10000.0)
        * jnp.arange(0, d_model, 2, dtype=jnp.float32) / d_model
    )                                                                      # (d_model//2,)
    ang = position * div_term                                              # (max_len, d_model//2)
    # even channels = sin, odd channels = cos (interleaved)
    pe = jnp.stack([jnp.sin(ang), jnp.cos(ang)], axis=-1).reshape(max_len, d_model)
    return pe[None, :, :]


# ----------------------------------------------------------------------------
# small helpers
# ----------------------------------------------------------------------------
def _device_kind() -> str:
    try:
        return jax.devices()[0].device_kind.lower()
    except Exception:
        return ""


def _target_tile_bytes() -> int:
    """Per-operand tile size: ~2 MiB on v5e and older, ~4 MiB on v6e/v7x."""
    kind = _device_kind()
    if any(v in kind for v in ("v2", "v3", "v4", "v5")):
        return 2 << 20
    return 4 << 20


def _default_min_pallas_bytes() -> int:
    """Payload below this uses the fused XLA add (higher cutoff on v7x)."""
    return (2 << 20) if "v7" in _device_kind() else (1 << 20)


def _sublane_multiple(dtype) -> int:
    return {4: 8, 2: 16, 1: 32}.get(jnp.dtype(dtype).itemsize, 8)


def _round_up(n: int, m: int) -> int:
    return ((n + m - 1) // m) * m


# ----------------------------------------------------------------------------
# kernel
# ----------------------------------------------------------------------------
def _pe_add_kernel(x_ref, pe_ref, o_ref):
    # x may be bf16 while pe is f32: the add promotes to f32 and the result is
    # cast once on store (avoids pre-rounding pe to the activation dtype).
    o_ref[...] = (x_ref[...] + pe_ref[...]).astype(o_ref.dtype)


def _pe_add_pallas(x, pe, *, donate_x=False, target_tile_bytes=None):
    """x: (B, R, C); pe: (1, Rpe, C) with Rpe >= R. Returns x + pe[:, :R] in x.dtype."""
    B, R, C = x.shape
    _, Rpe, Cpe = pe.shape
    assert Cpe == C

    if target_tile_bytes is None:
        target_tile_bytes = _target_tile_bytes()

    x_item = jnp.dtype(x.dtype).itemsize
    pe_item = jnp.dtype(pe.dtype).itemsize
    itemsize = max(x_item, pe_item)
    sub = max(_sublane_multiple(x.dtype), _sublane_multiple(pe.dtype))

    # Rows per tile: dtype-native sublane multiple, ~target_tile_bytes/operand.
    max_rows = max(sub, ((target_tile_bytes // (C * itemsize)) // sub) * sub)
    tile_rows = min(max_rows, _round_up(R, sub))
    num_l_tiles = pl.cdiv(R, tile_rows)

    # Double-buffered footprint: x + out (x dtype) + pe (f32), 2 buffers each.
    vmem_needed = 2 * tile_rows * C * (2 * x_item + pe_item)
    vmem_limit = max(32 * 1024 * 1024, vmem_needed + (4 << 20))

    # Advisory hint so XLA can overlap this memory-bound call with neighbors.
    cost = pl.CostEstimate(
        flops=B * R * C,
        transcendentals=0,
        bytes_accessed=2 * B * R * C * x_item + min(R, Rpe) * C * pe_item,
    )

    grid_spec = pltpu.PrefetchScalarGridSpec(
        num_scalar_prefetch=0,
        # Batch innermost: pe's block index only changes on the outer (L) axis,
        # so each pe tile is fetched once per L-tile and reused across batch.
        grid=(num_l_tiles, B),
        in_specs=[
            pl.BlockSpec((1, tile_rows, C), lambda l, b: (b, l, 0)),   # x
            pl.BlockSpec((1, tile_rows, C), lambda l, b: (0, l, 0)),   # pe (windowed)
        ],
        out_specs=pl.BlockSpec((1, tile_rows, C), lambda l, b: (b, l, 0)),
    )

    extra = {}
    if donate_x:
        extra["input_output_aliases"] = {0: 0}   # reuse x's HBM buffer

    return pl.pallas_call(
        _pe_add_kernel,
        out_shape=jax.ShapeDtypeStruct((B, R, C), x.dtype),
        grid_spec=grid_spec,
        compiler_params=pltpu.CompilerParams(
            # "arbitrary" on batch: megacore (v7x) only shards the L-tile axis,
            # preserving per-core pe-tile reuse and load balance for small B.
            dimension_semantics=("parallel", "arbitrary"),
            vmem_limit_bytes=vmem_limit,
        ),
        cost_estimate=cost,
        **extra,
    )(x, pe)


# ----------------------------------------------------------------------------
# forward
# ----------------------------------------------------------------------------
def positional_encoding_forward(x, pe, *, donate_x=False,
                                min_pallas_bytes=None, target_tile_bytes=None):
    """x: (B, L, D); pe: (1, max_len, D) float32 buffer. Returns x + pe[:, :L]."""
    B, L, D = x.shape
    assert pe.ndim == 3 and pe.shape[0] == 1 and pe.shape[2] == D
    max_len = pe.shape[1]
    assert L <= max_len, f"sequence length {L} exceeds pe max_len {max_len}"

    out_dtype = x.dtype
    if min_pallas_bytes is None:
        min_pallas_bytes = _default_min_pallas_bytes()
    payload_bytes = x.size * jnp.dtype(x.dtype).itemsize

    # Tiny workloads: launch + pipeline overhead dominates; fused XLA add
    # (still adds in f32 and casts once).
    if payload_bytes < min_pallas_bytes:
        return (x + pe[:, :L]).astype(out_dtype)

    pe_flat_ok = (max_len * D) % 128 == 0
    g = 128 // math.gcd(D, 128)          # rows per full 128-lane group
    L_main = (L // g) * g                # largest prefix with (L_main*D) % 128 == 0

    if pe_flat_ok and L_main == L:
        # Fully lane-dense: contiguous (free) reshape to (..., 128) so every
        # store is an unmasked full-lane vst.  The full pe buffer is windowed
        # by the index_map -- no pe[:, :L] slice is materialized in HBM.
        out = _pe_add_pallas(
            x.reshape(B, (L * D) // 128, 128),
            pe.reshape(1, (max_len * D) // 128, 128),
            donate_x=donate_x, target_tile_bytes=target_tile_bytes)
        return out.reshape(B, L, D)

    if pe_flat_ok and L_main > 0 and 4 * (L - L_main) <= L:
        # Lane-dense on the main prefix; the <= (g-1)-row tail is a fused XLA
        # add.  (The x prefix slice and final concat are extra XLA copies; the
        # unmasked-store win on the bulk of the payload dominates for D < 128.)
        main = _pe_add_pallas(
            x[:, :L_main, :].reshape(B, (L_main * D) // 128, 128),
            pe.reshape(1, (max_len * D) // 128, 128),
            donate_x=False, target_tile_bytes=target_tile_bytes,
        ).reshape(B, L_main, D)
        tail = (x[:, L_main:, :] + pe[:, L_main:L, :]).astype(out_dtype)
        return jnp.concatenate([main, tail], axis=1)

    # General path: (1, tile_rows, D) tiles (masked partial-lane stores if D < 128).
    return _pe_add_pallas(x, pe, donate_x=donate_x,
                          target_tile_bytes=target_tile_bytes)


# ----------------------------------------------------------------------------
# self-test
# ----------------------------------------------------------------------------
if __name__ == "__main__":
    key = jax.random.PRNGKey(0)

    # (name, B, L, D, max_len, dtype, force_pallas)
    cases = [
        ("lane_dense_full",      2,  64, 128, 4096, jnp.float32,  True),
        ("lane_dense_bf16",      2,  64, 128, 4096, jnp.bfloat16, True),
        ("split_main_plus_tail", 2, 100,  48, 4096, jnp.float32,  True),  # L_main=96, tail=4
        ("general_small_L",      2,  12,  48, 4096, jnp.float32,  True),  # falls to general path
        ("edge_L_eq_max_len",    2,  36,  32,   36, jnp.float32,  True),  # partial tile at max_len
        ("xla_tiny_fallback",    2,   8,  32, 4096, jnp.float32,  False),
    ]

    for name, B, L, D, max_len, dtype, force in cases:
        key, sub = jax.random.split(key)
        x = jax.random.normal(sub, (B, L, D), dtype=jnp.float32).astype(dtype)
        pe = _build_pe(D, max_len)            # float32 registered buffer

        kwargs = {"min_pallas_bytes": 0} if force else {}
        out = jax.block_until_ready(positional_encoding_forward(x, pe, **kwargs))

        ref = (x + pe[:, :L]).astype(dtype)   # same promote-to-f32, cast-once semantics
        assert out.shape == (B, L, D), f"{name}: bad shape {out.shape}"
        assert out.dtype == dtype, f"{name}: bad dtype {out.dtype}"
        tol = 1e-6 if dtype == jnp.float32 else 2e-2
        ok = jnp.allclose(out.astype(jnp.float32), ref.astype(jnp.float32),
                          atol=tol, rtol=tol)
        assert ok, f"{name}: mismatch vs reference"

    print("KERNEL_OK")
</pallas_src>

<mosaic_0001>
module attributes {stable_mosaic.version = 11 : i64} {
  func.func @_pe_add_kernel(%arg0: i32, %arg1: i32, %arg2: memref<1x64x128xf32, #tpu.memory_space<vmem>>, %arg3: memref<1x64x128xf32, #tpu.memory_space<vmem>>, %arg4: memref<1x64x128xf32, #tpu.memory_space<vmem>>) attributes {dimension_semantics = [#tpu.dimension_semantics<parallel>, #tpu.dimension_semantics<arbitrary>], iteration_bounds = array<i64: 1, 2>, scalar_prefetch = 0 : i64, scratch_operands = 0 : i64, tpu.core_type = #tpu.core_type<tc>, window_params = [{transform_indices = @transform_0, window_bounds = array<i64: 1, 64, 128>}, {transform_indices = @transform_1, window_bounds = array<i64: 1, 64, 128>}, {transform_indices = @transform_2, window_bounds = array<i64: 1, 64, 128>}]} {
    %c0 = arith.constant 0 : index
    %c0_0 = arith.constant 0 : index
    %c0_1 = arith.constant 0 : index
    %0 = vector.load %arg2[%c0, %c0_0, %c0_1] : memref<1x64x128xf32, #tpu.memory_space<vmem>>, vector<1x64x128xf32>
    %c0_2 = arith.constant 0 : index
    %c0_3 = arith.constant 0 : index
    %c0_4 = arith.constant 0 : index
    %1 = vector.load %arg3[%c0_2, %c0_3, %c0_4] : memref<1x64x128xf32, #tpu.memory_space<vmem>>, vector<1x64x128xf32>
    %2 = arith.addf %0, %1 : vector<1x64x128xf32>
    %c0_5 = arith.constant 0 : index
    %c0_6 = arith.constant 0 : index
    %c0_7 = arith.constant 0 : index
    %3 = vector.load %arg4[%c0_5, %c0_6, %c0_7] : memref<1x64x128xf32, #tpu.memory_space<vmem>>, vector<1x64x128xf32>
    tpu.vector_store %arg4[%c0_5, %c0_6, %c0_7], %2 {strides = array<i32>} : memref<1x64x128xf32, #tpu.memory_space<vmem>>, vector<1x64x128xf32>,
    return
  }
  func.func @transform_0(%arg0: i32, %arg1: i32) -> (i32, i32, i32) {
    %c0_i32 = arith.constant 0 : i32
    %c0_i32_0 = arith.constant 0 : i32
    return %arg1, %arg0, %c0_i32 : i32, i32, i32
  }
  func.func @transform_1(%arg0: i32, %arg1: i32) -> (i32, i32, i32) {
    %c0_i32 = arith.constant 0 : i32
    %c0_i32_0 = arith.constant 0 : i32
    %c0_i32_1 = arith.constant 0 : i32
    return %c0_i32, %arg0, %c0_i32_0 : i32, i32, i32
  }
  func.func @transform_2(%arg0: i32, %arg1: i32) -> (i32, i32, i32) {
    %c0_i32 = arith.constant 0 : i32
    %c0_i32_0 = arith.constant 0 : i32
    return %arg1, %arg0, %c0_i32 : i32, i32, i32
  }
}

</mosaic_0001>

<bundles_post_ra>
// kernel: tpu_custom_call.1
= control target key start
LH: loop header
LB: loop body
LE: loop exit
PB: predicated region body
PF: predicated region fallthrough
CT: control target
= control target key end

     0   :  { %7 = vsyncpa [#allocation3], 0  ;;  %s862_s0 = inlined_call_operand.hbm [shape: f32[2,64,128], index: 0, kind: input, shape index: {}]   ;;  %s863_s1 = inlined_call_operand.hbm [shape: f32[1,4096,128], index: 1, kind: input, shape index: {}]   ;;  %s864_s2 = inlined_call_operand.hbm [shape: f32[2,64,128], index: 2, kind: output, shape index: {}]  }
   0x1   :  { %9 = vsyncpa [#allocation3 + $0x1], 0 }
   0x2   :  { %10 = vsyncpa [#allocation6], 0 }
   0x3   :  { %11 = vsyncpa [#allocation4], 0 }
   0x4   :  { %13 = vsyncpa [#allocation4 + $0x1], 0  ;;  %s617_s9 = smov 0   ;;  %s619_s10 = smov 0  }
   0x5   :  { %s621_s11 = smov 0   ;;  %s623_s12 = smov 0  }
   0x6   :  { %s625_s13 = smov 0   ;;  %s627_s14 = smov 0  }
   0x7 LB: > { %s353_s15 = sadd.s32 4294967295, %s593_s14   ;;  %s354_s16 = sadd.s32 4294967294, %s593_s14   ;;  %s593_s14 = sphi %s627_s14, %s19_s14   ;;  %s589_s13 = sphi %s625_s13, %s888_s13   ;;  %s585_s12 = sphi %s623_s12, %s887_s12   ;;  %s581_s11 = sphi %s621_s11, %s886_s11   ;;  %s577_s10 = sphi %s619_s10, %s885_s10   ;;  %s573_s9 = sphi %s617_s9, %s884_s9  }
   0x8   : > { %p53_p0 = scmp.ne.s32.totalorder %s577_s10, %s573_s9  ;;  %p651_p1 = scmp.eq.s32.totalorder %s353_s15, 0 }
   0x9   : > { %p655_p2 = scmp.eq.s32.totalorder %s353_s15, 1  ;;  %p111_p3 = scmp.eq.s32.totalorder %s354_s16, 1 }
   0xa   : > { %s869_s17 = scalar_select %p651_p1, 1, 0 }
   0xb   : > { %s870_s18 = scalar_select %p655_p2, 1, 0 }
   0xc   : > { %p661_p4 = por %p651_p1, %p53_p0  ;;  %p355_p5 = scmp.ge.s32.totalorder %s593_s14, 1 }
   0xd   : > { %p666_p6 = por %p111_p3, %p53_p0  ;;  %p118_p7 = scmp.lt.s32.totalorder %s593_s14, 3 }
   0xe   : > { %s871_s19 = scalar_select %p661_p4, 1, 0 }
   0xf   : > { %s872_s20 = scalar_select %p666_p6, 1, 0 }
  0x10   : > { %p671_p8 = pnand %p355_p5, %p118_p7  ;;  %s595_s22 = smov [#allocation5]  }
  0x11   : > { %s133_s23 = sshll.u32 %s595_s22, 4  ;;  %s28_s25 = sadd.s32 1, %s589_s13  ;;  %s675_s23 = int_to_ptr.vmem [resolvable:$true] %s133_s23 }
  0x12   : > { %s873_s21 = scalar_select %p671_p8, 1, 0 }
  0x13   : > { %p380_p9 = pneg %p671_p8  ;;  %s449_s28 = scalar_lea.hbm %s863_s1, 1024 }
  0x14   : > { %p450_p12 = scmp.ne.s32.totalorder %s863_s1, %s449_s28  ;;  %s454_s5 = scalar_lea.hbm %s863_s1, 65536 }
  0x15   : > { %p682_p11 = pnand %p380_p9, %p651_p1  ;;  %p455_p5 = scmp.lt.u32.totalorder %s454_s5, %s449_s28 }
  0x16   : > { %p456_p7 = scmp.lt.u32.totalorder %s449_s28, %s863_s1 }
  0x17   : > { %p451_p13 = pneg %p682_p11 }
  0x18   : > { %p457_p9 = por %p456_p7, %p455_p5 }
  0x19   : > { %p452_p0 = pnand %p451_p13, %p450_p12 }
  0x1b   : > { %p453_p3 = pneg %p452_p0 }
  0x1d   : > { %p458_p10 = pnand %p457_p9, %p453_p3 }
  0x1f   : > { %461 = shalt.err (!%p458_p10)
}
  0x20   : > { %s462_s8 = scalar_lea.vmem %s675_s23, 1024  ;;  %p470_p0 = scmp.lt.s32.totalorder %s675_s23, %s675_s23 }
  0x21   : > { %p463_p6 = scmp.ne.s32.totalorder %s675_s23, %s462_s8  ;;  %p471_p4 = scmp.lt.s32.totalorder %s462_s8, %s462_s8 }
  0x23   : > { %p465_p1 = pnand %p463_p6, %p451_p13  ;;  %p472_p8 = por %p471_p4, %p470_p0 }
  0x25   : > { %p466_p12 = pneg %p465_p1 }
  0x27   : > { %p473_p2 = pnand %p472_p8, %p466_p12 }
  0x29   : > { %476 = shalt.err (!%p473_p2)
}
  0x2a   : > { %s596_s15 = smov 128   ;;  %s597_s16 = smov 8  }
  0x2b   : > { %383 = dma.hbm_to_vmem [thread:$0]  (!%p682_p11), %s863_s1, 1024, %s675_s23, [#allocation6], %s596_s15, %s596_s15, %s597_s16  }
  0x2c   : > { %p29_p1 = scmp.ge.s32.totalorder %s28_s25, 2  ;;  %s40_s27 = sadd.s32 1, %s581_s11 }
  0x2d   : > { %p47_p2 = scmp.ne.s32.totalorder %s581_s11, %s577_s10  ;;  %p48_p4 = scmp.eq.s32.totalorder %s593_s14, 0 }
  0x2e   : > { %s890_s25 = smov (%p29_p1, %s28_s25), 0  ;;  %p876_p8 = scmp.ne.s32.totalorder %s870_s18, 0 }
  0x2f   : > { %p720_p6 = por %p48_p4, %p47_p2  ;;  %s35_s29 = ssub.s32 %s589_s13, %s890_s25 }
  0x30   : > { %p726_p10 = por %p876_p8, %p47_p2  ;;  %p393_p13 = scmp.lt.s32.totalorder %s593_s14, 2 }
  0x31   : > { %p38_p11 = scmp.eq.s32.totalorder %s35_s29, 0  ;;  %s147_s23 = sand.u32 1, %s581_s11  }
  0x32   : > { %s358_s30 = sshll.u32 %s147_s23, 6  ;;  %s370_s4 = sshll.u32 %s589_s13, 10 }
  0x33   : > { %s735_s3 = scalar_select %p38_p11, %s581_s11, %s40_s27  }
  0x34   : > { %s741_s7 = scalar_lea.hbm %s862_s0, %s370_s4  ;;  %s151_s18 = scalar_lea.vmem [#allocation2], %s358_s30 }
  0x35   : > { %s160_s8 = sshll.u32 %s151_s18, 4  ;;  %p747_p3 = pnand %p393_p13, %p720_p6  ;;  %s743_s8 = int_to_ptr.vmem [resolvable:$true] %s160_s8 }
  0x36   : > { %s751_s26 = scalar_lea.sflag [#allocation3], %s147_s23  ;;  %s477_s27 = scalar_lea.hbm %s741_s7, 1024 }
  0x37   : > { %p478_p5 = scmp.ne.s32.totalorder %s741_s7, %s477_s27  ;;  %p479_p7 = pneg %p747_p3 }
  0x38   : > { %s482_s28 = scalar_lea.hbm %s862_s0, 2048  ;;  %p483_p0 = scmp.lt.u32.totalorder %s741_s7, %s862_s0 }
  0x39   : > { %p480_p9 = pnand %p479_p7, %p478_p5  ;;  %p484_p1 = scmp.lt.u32.totalorder %s482_s28, %s477_s27 }
  0x3a   : > { %p486_p4 = scmp.lt.u32.totalorder %s477_s27, %s741_s7 }
  0x3b   : > { %p481_p12 = pneg %p480_p9  ;;  %p485_p2 = por %p484_p1, %p483_p0 }
  0x3d   : > { %p487_p6 = por %p486_p4, %p485_p2 }
  0x3f   : > { %p488_p8 = pnand %p487_p6, %p481_p12 }
  0x41   : > { %491 = shalt.err (!%p488_p8)
}
  0x42   : > { %s492_s23 = scalar_lea.vmem %s743_s8, 1024  ;;  %s598_s6 = smov [#allocation2]  }
  0x43   : > { %p493_p13 = scmp.ne.s32.totalorder %s743_s8, %s492_s23  ;;  %s497_s18 = sshll.u32 %s598_s6, 4  ;;  %s498_s18 = int_to_ptr.vmem [resolvable:$false] %s497_s18 }
  0x44   : > { %s499_s29 = scalar_lea.vmem %s498_s18, 2048  ;;  %p500_p9 = scmp.lt.s32.totalorder %s743_s8, %s498_s18 }
  0x45   : > { %p495_p11 = pnand %p493_p13, %p479_p7  ;;  %p501_p0 = scmp.lt.s32.totalorder %s499_s29, %s492_s23 }
  0x47   : > { %p496_p5 = pneg %p495_p11  ;;  %p502_p1 = por %p501_p0, %p500_p9 }
  0x49   : > { %p503_p2 = pnand %p502_p1, %p496_p5 }
  0x4b   : > { %506 = shalt.err (!%p503_p2)
}
  0x4c   : > { %387 = dma.hbm_to_vmem [thread:$0]  (!%p747_p3), %s741_s7, 1024, %s743_s8, %s751_s26, %s596_s15, %s596_s15, %s597_s16  }
  0x4d   : > { %p879_p7 = scmp.ne.s32.totalorder %s873_s21, 0 }
  0x4e   : > { %s785_s27 = sand.u32 (!%p879_p7), 1, %s577_s10   ;;  %p880_p12 = scmp.ne.s32.totalorder (!%p879_p7), %s871_s19, 0 }
  0x4f   : > { %172 = sbr.rel (%p879_p7) target bundleno = 116 (0x74), region = 28  ;;  %s362_s30 = sshll.u32 (!%p879_p7), %s785_s27, 6 }
  0x50   : > { %s175_s28 = scalar_lea.sflag (!%p879_p7), [#allocation3], %s785_s27  ;;  %s789_s4 = scalar_lea.vmem (!%p879_p7), [#allocation2], %s362_s30 }
  0x56   : > { %560 = dma.done.wait (%p880_p12), %s175_s28, 1024  }
  0x57   : > { %562 = vsyncadd (%p880_p12), %s175_s28, 4294966272  ;;  %p881_p3 = scmp.ne.s32.totalorder %s869_s17, 0 }
  0x59   : > { %564 = dma.done.wait (%p881_p3), [#allocation6], 1024  }
  0x5a   : > { %566 = vsyncadd (%p881_p3), [#allocation6], 4294966272  ;;  %v206_v0 = vld [vmem:[%s789_s4] sm:$0xff]  ;;  %v207_v2 = vld [vmem:[%s789_s4 + $0x8] sm:$0xff]  ;;  %s202_s19 = scalar_lea.vmem [#allocation7], %s362_s30  ;;  %s371_s17 = sshll.u32 %s585_s12, 10 }
  0x5b   : > { %v214_v1 = vld [vmem:[#allocation5] sm:$0xff]  ;;  %v215_v4 = vld [vmem:[#allocation5 + $0x8] sm:$0xff]  ;;  %v208_v5 = vld [vmem:[%s789_s4 + $0x10] sm:$0xff]  ;;  %s254_s21 = sshll.u32 %s202_s19, 4  ;;  %s813_s16 = scalar_lea.hbm %s864_s2, %s371_s17  ;;  %s808_s21 = int_to_ptr.vmem [resolvable:$true] %s254_s21 }
  0x5c   : > { %v222_v3 = vadd.f32 %v214_v1, %v206_v0  ;;  %v216_v6 = vld [vmem:[#allocation5 + $0x10] sm:$0xff]  ;;  %v223_v7 = vadd.f32 %v215_v4, %v207_v2  ;;  %v209_v9 = vld [vmem:[%s789_s4 + $0x18] sm:$0xff]  ;;  %v210_v11 = vld [vmem:[%s789_s4 + $0x20] sm:$0xff]  ;;  %s239_s7 = scalar_lea.sflag [#allocation4], %s785_s27  ;;  %s507_s8 = scalar_lea.vmem %s808_s21, 1024 }
  0x5d   : > { %v224_v8 = vadd.f32 %v216_v6, %v208_v5  ;;  %v217_v10 = vld [vmem:[#allocation5 + $0x18] sm:$0xff]  ;;  %v218_v13 = vld [vmem:[#allocation5 + $0x20] sm:$0xff]  ;;  %v211_v14 = vld [vmem:[%s789_s4 + $0x28] sm:$0xff]  ;;  %p508_p4 = scmp.ne.s32.totalorder %s808_s21, %s507_s8  ;;  %s599_s22 = smov [#allocation7]  }
  0x5e   : > { %230 = vst [vmem:[%s202_s19] sm:$0xff] %v222_v3  ;;  %v225_v12 = vadd.f32 %v217_v10, %v209_v9  ;;  %v219_v15 = vld [vmem:[#allocation5 + $0x28] sm:$0xff]  ;;  %231 = vst [vmem:[%s202_s19 + $0x8] sm:$0xff] %v223_v7  ;;  %v226_v16 = vadd.f32 %v218_v13, %v210_v11  ;;  %v212_v18 = vld [vmem:[%s789_s4 + $0x30] sm:$0xff]  ;;  %s511_s26 = sshll.u32 %s599_s22, 4  ;;  %s512_s26 = int_to_ptr.vmem [resolvable:$false] %s511_s26 }
  0x5f   : > { %232 = vst [vmem:[%s202_s19 + $0x10] sm:$0xff] %v224_v8  ;;  %v227_v17 = vadd.f32 %v219_v15, %v211_v14  ;;  %v220_v19 = vld [vmem:[#allocation5 + $0x30] sm:$0xff]  ;;  %v213_v20 = vld [vmem:[%s789_s4 + $0x38] sm:$0xff]  ;;  %p509_p6 = pnand %p508_p4, %p726_p10  ;;  %s513_s5 = scalar_lea.vmem %s512_s26, 2048 }
  0x60   : > { %233 = vst [vmem:[%s202_s19 + $0x18] sm:$0xff] %v225_v12  ;;  %v228_v21 = vadd.f32 %v220_v19, %v212_v18  ;;  %v221_v22 = vld [vmem:[#allocation5 + $0x38] sm:$0xff]  ;;  %234 = vst [vmem:[%s202_s19 + $0x20] sm:$0xff] %v226_v16  ;;  %p514_p13 = scmp.lt.s32.totalorder %s808_s21, %s512_s26  ;;  %p515_p11 = scmp.lt.s32.totalorder %s513_s5, %s507_s8 }
  0x61   : > { %235 = vst [vmem:[%s202_s19 + $0x28] sm:$0xff] %v227_v17  ;;  %v229_v23 = vadd.f32 %v221_v22, %v213_v20  ;;  %p510_p8 = pneg %p509_p6 }
  0x62   : > { %236 = vst [vmem:[%s202_s19 + $0x30] sm:$0xff] %v228_v21  ;;  %p516_p5 = por %p515_p11, %p514_p13 }
  0x63   : > { %237 = vst [vmem:[%s202_s19 + $0x38] sm:$0xff] %v229_v23 }
  0x64   : > { %p517_p9 = pnand %p516_p5, %p510_p8 }
  0x66   : > { %520 = shalt.err (!%p517_p9)
}
  0x67   : > { %s521_s23 = scalar_lea.hbm %s813_s16, 1024  ;;  %s525_s29 = scalar_lea.hbm %s864_s2, 2048 }
  0x68   : > { %p522_p0 = scmp.ne.s32.totalorder %s813_s16, %s521_s23  ;;  %p526_p7 = scmp.lt.u32.totalorder %s813_s16, %s864_s2 }
  0x69   : > { %p527_p12 = scmp.lt.u32.totalorder %s525_s29, %s521_s23  ;;  %p529_p4 = scmp.lt.u32.totalorder %s521_s23, %s813_s16 }
  0x6a   : > { %p523_p1 = pnand %p522_p0, %p726_p10 }
  0x6b   : > { %p528_p3 = por %p527_p12, %p526_p7 }
  0x6c   : > { %p524_p2 = pneg %p523_p1 }
  0x6d   : > { %p530_p6 = por %p529_p4, %p528_p3 }
  0x6f   : > { %p531_p8 = pnand %p530_p6, %p524_p2 }
  0x71   : > { %534 = shalt.err (!%p531_p8)
}
  0x72   : > { %s600_s4 = smov 128   ;;  %s601_s19 = smov 8  }
  0x73   : > { %378 = dma.vmem_to_hbm [thread:$0]  (%p726_p10), %s808_s21, 1024, %s813_s16, %s239_s7, %s600_s4, %s600_s4, %s601_s19  }
  0x74 PF: > { %s269_s17 = sand.u32 1, %s573_s9   ;;  %p882_p13 = scmp.ne.s32.totalorder %s872_s20, 0 }
  0x75   : > { %p883_p11 = scmp.ge.s32.totalorder %s593_s14, 2  ;;  %s270_s12 = scalar_lea.sflag [#allocation4], %s269_s17 }
  0x77   : > { %p389_p5 = pnand %p883_p11, %p882_p13 }
  0x79   : > { %568 = dma.done.wait (!%p389_p5), %s270_s12, 1024  }
  0x7a   : > { %570 = vsyncadd (!%p389_p5), %s270_s12, 4294966272  ;;  %s19_s14 = sadd.s32 1, %s593_s14   ;;  %s884_s9 = smov %s577_s10 }
  0x7b   : > { %p16_p9 = scmp.ge.s32.totalorder %s19_s14, 4   ;;  %s885_s10 = smov %s581_s11 }
  0x7c   : > { %s886_s11 = smov %s735_s3  ;;  %s887_s12 = smov %s589_s13 }
  0x7d   : > { %s888_s13 = smov %s890_s25  ;;  %18 = sbr.rel (!%p16_p9) target bundleno = 7 (0x7), region = 78 }
  0x84   :  { %275 = vsyncpa [#allocation3], 1 }
  0x85   :  { %277 = vsyncpa [#allocation3 + $0x1], 1 }
  0x86   :  { %278 = vsyncpa [#allocation6], 1 }
  0x87   :  { %279 = vsyncpa [#allocation4], 1 }
  0x88   :  { %281 = vsyncpa [#allocation4 + $0x1], 1 }

</bundles_post_ra>
